<compile_context>
chip_gen: v6e
topology: v6e:2x2x1
jax: 0.10.0
libtpu: 0.0.40
codegen_flags: <defaults>
</compile_context>

<pallas_src>
import functools

import jax
import jax.numpy as jnp
from jax.experimental import pallas as pl
from jax.experimental.pallas import tpu as pltpu

LANES = 128            # lane (minor) tile width
MAX_BLOCK_ROWS = 512   # up to 512x128 f32 = 256 KiB per input block per step


# ---------------------------------------------------------------------------
# Pallas kernel: fused sigmoid + per-sample reductions + dice/penalty
# ---------------------------------------------------------------------------
def _dice_kernel(x_ref, t_ref, dice_ref, pen_ref,
                 ip_acc, ps_acc, ts_acc, es_acc,
                 *, smooth, weight, valid_rows, block_rows):
    # x_ref, t_ref:      (1, block_rows, LANES) tile of the flattened sample
    # dice_ref, pen_ref: (1, 1, LANES) per-sample outputs (value broadcast over lanes)
    # *_acc:             (1, LANES) lane-parallel partial-sum accumulators (VMEM)
    ti = pl.program_id(1)

    @pl.when(ti == 0)
    def _init():
        ip_acc[...] = jnp.zeros_like(ip_acc)
        ps_acc[...] = jnp.zeros_like(ps_acc)
        ts_acc[...] = jnp.zeros_like(ts_acc)
        es_acc[...] = jnp.zeros_like(es_acc)

    x = x_ref[0].astype(jnp.float32)                 # (block_rows, LANES)
    t = t_ref[0].astype(jnp.float32)
    p = 1.0 / (1.0 + jnp.exp(-x))                    # sigmoid; exp goes to the EUP slot

    # Mask the ragged row tail of the last tile. Statically skipped when the row count
    # divides the block size, so aligned shapes pay nothing.
    if valid_rows % block_rows != 0:
        row = ti * block_rows + jax.lax.broadcasted_iota(jnp.int32, (block_rows, 1), 0)
        keep = row < valid_rows
        p = jnp.where(keep, p, 0.0)
        t = jnp.where(keep, t, 0.0)

    pt = p * t
    et = (1.0 - p) * t
    # Sublane (XLU) reductions to lane-parallel partials; accumulate across tiles.
    ip_acc[...] += jnp.sum(pt, axis=0, keepdims=True)
    ps_acc[...] += jnp.sum(p, axis=0, keepdims=True)
    ts_acc[...] += jnp.sum(t, axis=0, keepdims=True)
    es_acc[...] += jnp.sum(et, axis=0, keepdims=True)

    @pl.when(ti == pl.num_programs(1) - 1)
    def _finish():
        inter = jnp.sum(ip_acc[...], axis=-1, keepdims=True)   # (1, 1)
        psum = jnp.sum(ps_acc[...], axis=-1, keepdims=True)
        tsum = jnp.sum(ts_acc[...], axis=-1, keepdims=True)
        esum = jnp.sum(es_acc[...], axis=-1, keepdims=True)
        dice = (2.0 * inter + smooth) / (psum + tsum + smooth)
        pen = weight * (esum / tsum)
        # Lane-dense (128-wide) unmasked stores of the per-sample scalars.
        dice_ref[...] = jnp.broadcast_to(dice, dice_ref.shape)
        pen_ref[...] = jnp.broadcast_to(pen, pen_ref.shape)


# ---------------------------------------------------------------------------
# JAX glue
# ---------------------------------------------------------------------------
def _nearest_resize(t, out_h, out_w):
    # TODO(synk): nnF.interpolate(mode='nearest') equivalent done as a plain JAX gather
    # (index plumbing, not a Pallas kernel). src = floor(dst * in / out), like PyTorch.
    in_h, in_w = t.shape[-2], t.shape[-1]
    hi = (jnp.arange(out_h) * in_h) // out_h
    wi = (jnp.arange(out_w) * in_w) // out_w
    return t[..., hi[:, None], wi[None, :]]


@functools.partial(jax.jit, static_argnames=("smooth", "empty_penalty_weight"))
def dice_loss_with_empty_penalty(inputs, targets, *, smooth=1.0, empty_penalty_weight=0.0):
    inputs = inputs.astype(jnp.float32)
    targets = targets.astype(jnp.float32)

    if inputs.shape[-2:] != targets.shape[-2:]:
        targets = _nearest_resize(targets, inputs.shape[-2], inputs.shape[-1])

    B = inputs.shape[0]
    x = inputs.reshape(B, -1)
    t = targets.reshape(B, -1)
    if x.shape != t.shape:
        raise ValueError(f"flattened shapes differ: {x.shape} vs {t.shape}")
    L = x.shape[1]

    # Reshape each flattened sample to (rows, 128) lanes. Only a <128-element lane pad
    # may be needed; pad logits with a huge negative (sigmoid -> exactly 0) and targets
    # with 0 so padded elements contribute nothing to any of the four sums.
    r = pl.cdiv(L, LANES)
    lane_pad = r * LANES - L
    if lane_pad:
        x = jnp.pad(x, ((0, 0), (0, lane_pad)), constant_values=-1e30)
        t = jnp.pad(t, ((0, 0), (0, lane_pad)), constant_values=0.0)
    x3 = x.reshape(B, r, LANES)
    t3 = t.reshape(B, r, LANES)

    # Row tiling: full-extent block when small (no partial blocks), else 512-row blocks
    # (ragged tail handled by the in-kernel mask).
    br = min(r, MAX_BLOCK_ROWS)
    n_tiles = pl.cdiv(r, br)

    kernel = functools.partial(
        _dice_kernel,
        smooth=float(smooth),
        weight=float(empty_penalty_weight),
        valid_rows=r,
        block_rows=br,
    )

    in_blk = pl.BlockSpec((1, br, LANES), lambda b, ti: (b, ti, 0))
    out_blk = pl.BlockSpec((1, 1, LANES), lambda b, ti: (b, 0, 0))

    dice, pen = pl.pallas_call(
        kernel,
        grid=(B, n_tiles),
        in_specs=[in_blk, in_blk],
        out_specs=[out_blk, out_blk],
        out_shape=(jax.ShapeDtypeStruct((B, 1, LANES), jnp.float32),
                   jax.ShapeDtypeStruct((B, 1, LANES), jnp.float32)),
        scratch_shapes=[pltpu.VMEM((1, LANES), jnp.float32) for _ in range(4)],
        compiler_params=pltpu.CompilerParams(
            dimension_semantics=("parallel", "arbitrary")),
    )(x3, t3)

    dice_b = dice[:, 0, 0]   # (B,)
    pen_b = pen[:, 0, 0]     # (B,)
    return 1.0 - jnp.mean(dice_b) + jnp.mean(pen_b)


# ---------------------------------------------------------------------------
# pure-JAX reference (mirrors the PyTorch module) for a correctness check
# ---------------------------------------------------------------------------
def _dice_loss_reference(inputs, targets, smooth=1.0, empty_penalty_weight=0.0):
    p = jax.nn.sigmoid(inputs.astype(jnp.float32))
    t = targets.astype(jnp.float32)
    if p.shape[-2:] != t.shape[-2:]:
        t = _nearest_resize(t, p.shape[-2], p.shape[-1])
    B = p.shape[0]
    p = p.reshape(B, -1)
    t = t.reshape(B, -1)
    inter = jnp.sum(p * t, axis=1)
    dice = (2.0 * inter + smooth) / (jnp.sum(p, axis=1) + jnp.sum(t, axis=1) + smooth)
    pen = empty_penalty_weight * (jnp.sum((1.0 - p) * t, axis=1) / jnp.sum(t, axis=1))
    return 1.0 - jnp.mean(dice) + jnp.mean(pen)


if __name__ == "__main__":
    key = jax.random.PRNGKey(0)
    k1, k2, k3, k4 = jax.random.split(key, 4)

    # Case 1: mismatched spatial sizes (exercises the nearest-resize path).
    inputs = jax.random.normal(k1, (4, 64, 64), jnp.float32)                   # logits
    targets = (jax.random.uniform(k2, (4, 32, 32)) < 0.3).astype(jnp.float32)  # binary mask

    loss = dice_loss_with_empty_penalty(inputs, targets, smooth=1.0, empty_penalty_weight=0.5)
    loss = jax.block_until_ready(loss)
    ref = _dice_loss_reference(inputs, targets, 1.0, 0.5)
    assert loss.shape == ()
    assert bool(jnp.isfinite(loss))
    assert abs(float(loss) - float(ref)) <= 1e-5 + 1e-4 * abs(float(ref)), (float(loss), float(ref))

    # Case 2: odd, non-128-aligned flattened length (exercises the lane-pad path).
    inputs2 = jax.random.normal(k3, (2, 17, 19), jnp.float32)
    targets2 = (jax.random.uniform(k4, (2, 17, 19)) < 0.5).astype(jnp.float32)
    loss2 = dice_loss_with_empty_penalty(inputs2, targets2, smooth=1.0, empty_penalty_weight=0.25)
    loss2 = jax.block_until_ready(loss2)
    ref2 = _dice_loss_reference(inputs2, targets2, 1.0, 0.25)
    assert abs(float(loss2) - float(ref2)) <= 1e-5 + 1e-4 * abs(float(ref2)), (float(loss2), float(ref2))

    print("KERNEL_OK")
</pallas_src>

<mosaic_0001>
module attributes {stable_mosaic.version = 11 : i64} {
  func.func @_dice_kernel(%arg0: i32, %arg1: i32, %arg2: memref<1x32x128xf32, #tpu.memory_space<vmem>>, %arg3: memref<1x32x128xf32, #tpu.memory_space<vmem>>, %arg4: memref<1x1x128xf32, #tpu.memory_space<vmem>>, %arg5: memref<1x1x128xf32, #tpu.memory_space<vmem>>, %arg6: memref<1x128xf32, #tpu.memory_space<vmem>>, %arg7: memref<1x128xf32, #tpu.memory_space<vmem>>, %arg8: memref<1x128xf32, #tpu.memory_space<vmem>>, %arg9: memref<1x128xf32, #tpu.memory_space<vmem>>) attributes {dimension_semantics = [#tpu.dimension_semantics<parallel>, #tpu.dimension_semantics<arbitrary>], iteration_bounds = array<i64: 4, 1>, scalar_prefetch = 0 : i64, scratch_operands = 4 : i64, tpu.core_type = #tpu.core_type<tc>, window_params = [{transform_indices = @transform_0, window_bounds = array<i64: 1, 32, 128>}, {transform_indices = @transform_1, window_bounds = array<i64: 1, 32, 128>}, {transform_indices = @transform_2, window_bounds = array<i64: 1, 1, 128>}, {transform_indices = @transform_3, window_bounds = array<i64: 1, 1, 128>}]} {
    %c0_i32 = arith.constant 0 : i32
    %0 = arith.cmpi eq, %arg1, %c0_i32 : i32
    %1 = arith.extui %0 : i1 to i32
    %c0_i32_0 = arith.constant 0 : i32
    %2 = arith.cmpi ne, %1, %c0_i32_0 : i32
    scf.if %2 {
      %cst_31 = arith.constant 0.000000e+00 : f32
      %41 = vector.broadcast %cst_31 : f32 to vector<1x128xf32>
      %c0_32 = arith.constant 0 : index
      %c0_33 = arith.constant 0 : index
      %42 = vector.load %arg6[%c0_32, %c0_33] : memref<1x128xf32, #tpu.memory_space<vmem>>, vector<1x128xf32>
      tpu.vector_store %arg6[%c0_32, %c0_33], %41 {strides = array<i32>} : memref<1x128xf32, #tpu.memory_space<vmem>>, vector<1x128xf32>,
      %cst_34 = arith.constant 0.000000e+00 : f32
      %43 = vector.broadcast %cst_34 : f32 to vector<1x128xf32>
      %c0_35 = arith.constant 0 : index
      %c0_36 = arith.constant 0 : index
      %44 = vector.load %arg7[%c0_35, %c0_36] : memref<1x128xf32, #tpu.memory_space<vmem>>, vector<1x128xf32>
      tpu.vector_store %arg7[%c0_35, %c0_36], %43 {strides = array<i32>} : memref<1x128xf32, #tpu.memory_space<vmem>>, vector<1x128xf32>,
      %cst_37 = arith.constant 0.000000e+00 : f32
      %45 = vector.broadcast %cst_37 : f32 to vector<1x128xf32>
      %c0_38 = arith.constant 0 : index
      %c0_39 = arith.constant 0 : index
      %46 = vector.load %arg8[%c0_38, %c0_39] : memref<1x128xf32, #tpu.memory_space<vmem>>, vector<1x128xf32>
      tpu.vector_store %arg8[%c0_38, %c0_39], %45 {strides = array<i32>} : memref<1x128xf32, #tpu.memory_space<vmem>>, vector<1x128xf32>,
      %cst_40 = arith.constant 0.000000e+00 : f32
      %47 = vector.broadcast %cst_40 : f32 to vector<1x128xf32>
      %c0_41 = arith.constant 0 : index
      %c0_42 = arith.constant 0 : index
      %48 = vector.load %arg9[%c0_41, %c0_42] : memref<1x128xf32, #tpu.memory_space<vmem>>, vector<1x128xf32>
      tpu.vector_store %arg9[%c0_41, %c0_42], %47 {strides = array<i32>} : memref<1x128xf32, #tpu.memory_space<vmem>>, vector<1x128xf32>,
    } else {
    }
    %c0 = arith.constant 0 : index
    %c0_1 = arith.constant 0 : index
    %c0_2 = arith.constant 0 : index
    %3 = vector.load %arg2[%c0, %c0_1, %c0_2] : memref<1x32x128xf32, #tpu.memory_space<vmem>>, vector<1x32x128xf32>
    %4 = vector.shape_cast %3 : vector<1x32x128xf32> to vector<32x128xf32>
    %c0_3 = arith.constant 0 : index
    %c0_4 = arith.constant 0 : index
    %c0_5 = arith.constant 0 : index
    %5 = vector.load %arg3[%c0_3, %c0_4, %c0_5] : memref<1x32x128xf32, #tpu.memory_space<vmem>>, vector<1x32x128xf32>
    %6 = vector.shape_cast %5 : vector<1x32x128xf32> to vector<32x128xf32>
    %cst = arith.constant 0.000000e+00 : f32
    %7 = vector.broadcast %cst : f32 to vector<32x128xf32>
    %8 = arith.subf %7, %4 : vector<32x128xf32>
    %9 = math.exp %8 : vector<32x128xf32>
    %cst_6 = arith.constant 1.000000e+00 : f32
    %10 = vector.broadcast %cst_6 : f32 to vector<32x128xf32>
    %11 = arith.addf %10, %9 : vector<32x128xf32>
    %cst_7 = arith.constant 1.000000e+00 : f32
    %12 = vector.broadcast %cst_7 : f32 to vector<32x128xf32>
    %13 = arith.divf %12, %11 : vector<32x128xf32>
    %14 = arith.mulf %13, %6 : vector<32x128xf32>
    %cst_8 = arith.constant 1.000000e+00 : f32
    %15 = vector.broadcast %cst_8 : f32 to vector<32x128xf32>
    %16 = arith.subf %15, %13 : vector<32x128xf32>
    %17 = arith.mulf %16, %6 : vector<32x128xf32>
    %c0_9 = arith.constant 0 : index
    %c0_10 = arith.constant 0 : index
    %18 = vector.load %arg6[%c0_9, %c0_10] : memref<1x128xf32, #tpu.memory_space<vmem>>, vector<1x128xf32>
    %cst_11 = arith.constant dense<0.000000e+00> : vector<128xf32>
    %19 = vector.multi_reduction <add>, %14, %cst_11 [0] : vector<32x128xf32> to vector<128xf32>
    %20 = vector.shape_cast %19 : vector<128xf32> to vector<1x128xf32>
    %21 = arith.addf %18, %20 : vector<1x128xf32>
    %c0_12 = arith.constant 0 : index
    %c0_13 = arith.constant 0 : index
    %22 = vector.load %arg6[%c0_12, %c0_13] : memref<1x128xf32, #tpu.memory_space<vmem>>, vector<1x128xf32>
    tpu.vector_store %arg6[%c0_12, %c0_13], %21 {strides = array<i32>} : memref<1x128xf32, #tpu.memory_space<vmem>>, vector<1x128xf32>,
    %c0_14 = arith.constant 0 : index
    %c0_15 = arith.constant 0 : index
    %23 = vector.load %arg7[%c0_14, %c0_15] : memref<1x128xf32, #tpu.memory_space<vmem>>, vector<1x128xf32>
    %cst_16 = arith.constant dense<0.000000e+00> : vector<128xf32>
    %24 = vector.multi_reduction <add>, %13, %cst_16 [0] : vector<32x128xf32> to vector<128xf32>
    %25 = vector.shape_cast %24 : vector<128xf32> to vector<1x128xf32>
    %26 = arith.addf %23, %25 : vector<1x128xf32>
    %c0_17 = arith.constant 0 : index
    %c0_18 = arith.constant 0 : index
    %27 = vector.load %arg7[%c0_17, %c0_18] : memref<1x128xf32, #tpu.memory_space<vmem>>, vector<1x128xf32>
    tpu.vector_store %arg7[%c0_17, %c0_18], %26 {strides = array<i32>} : memref<1x128xf32, #tpu.memory_space<vmem>>, vector<1x128xf32>,
    %c0_19 = arith.constant 0 : index
    %c0_20 = arith.constant 0 : index
    %28 = vector.load %arg8[%c0_19, %c0_20] : memref<1x128xf32, #tpu.memory_space<vmem>>, vector<1x128xf32>
    %cst_21 = arith.constant dense<0.000000e+00> : vector<128xf32>
    %29 = vector.multi_reduction <add>, %6, %cst_21 [0] : vector<32x128xf32> to vector<128xf32>
    %30 = vector.shape_cast %29 : vector<128xf32> to vector<1x128xf32>
    %31 = arith.addf %28, %30 : vector<1x128xf32>
    %c0_22 = arith.constant 0 : index
    %c0_23 = arith.constant 0 : index
    %32 = vector.load %arg8[%c0_22, %c0_23] : memref<1x128xf32, #tpu.memory_space<vmem>>, vector<1x128xf32>
    tpu.vector_store %arg8[%c0_22, %c0_23], %31 {strides = array<i32>} : memref<1x128xf32, #tpu.memory_space<vmem>>, vector<1x128xf32>,
    %c0_24 = arith.constant 0 : index
    %c0_25 = arith.constant 0 : index
    %33 = vector.load %arg9[%c0_24, %c0_25] : memref<1x128xf32, #tpu.memory_space<vmem>>, vector<1x128xf32>
    %cst_26 = arith.constant dense<0.000000e+00> : vector<128xf32>
    %34 = vector.multi_reduction <add>, %17, %cst_26 [0] : vector<32x128xf32> to vector<128xf32>
    %35 = vector.shape_cast %34 : vector<128xf32> to vector<1x128xf32>
    %36 = arith.addf %33, %35 : vector<1x128xf32>
    %c0_27 = arith.constant 0 : index
    %c0_28 = arith.constant 0 : index
    %37 = vector.load %arg9[%c0_27, %c0_28] : memref<1x128xf32, #tpu.memory_space<vmem>>, vector<1x128xf32>
    tpu.vector_store %arg9[%c0_27, %c0_28], %36 {strides = array<i32>} : memref<1x128xf32, #tpu.memory_space<vmem>>, vector<1x128xf32>,
    %c0_i32_29 = arith.constant 0 : i32
    %38 = arith.cmpi eq, %arg1, %c0_i32_29 : i32
    %39 = arith.extui %38 : i1 to i32
    %c0_i32_30 = arith.constant 0 : i32
    %40 = arith.cmpi ne, %39, %c0_i32_30 : i32
    scf.if %40 {
      %c0_31 = arith.constant 0 : index
      %c0_32 = arith.constant 0 : index
      %41 = vector.load %arg6[%c0_31, %c0_32] : memref<1x128xf32, #tpu.memory_space<vmem>>, vector<1x128xf32>
      %cst_33 = arith.constant dense<0.000000e+00> : vector<1xf32>
      %42 = vector.multi_reduction <add>, %41, %cst_33 [1] : vector<1x128xf32> to vector<1xf32>
      %43 = vector.shape_cast %42 : vector<1xf32> to vector<1x1xf32>
      %c0_34 = arith.constant 0 : index
      %c0_35 = arith.constant 0 : index
      %44 = vector.load %arg7[%c0_34, %c0_35] : memref<1x128xf32, #tpu.memory_space<vmem>>, vector<1x128xf32>
      %cst_36 = arith.constant dense<0.000000e+00> : vector<1xf32>
      %45 = vector.multi_reduction <add>, %44, %cst_36 [1] : vector<1x128xf32> to vector<1xf32>
      %46 = vector.shape_cast %45 : vector<1xf32> to vector<1x1xf32>
      %c0_37 = arith.constant 0 : index
      %c0_38 = arith.constant 0 : index
      %47 = vector.load %arg8[%c0_37, %c0_38] : memref<1x128xf32, #tpu.memory_space<vmem>>, vector<1x128xf32>
      %cst_39 = arith.constant dense<0.000000e+00> : vector<1xf32>
      %48 = vector.multi_reduction <add>, %47, %cst_39 [1] : vector<1x128xf32> to vector<1xf32>
      %49 = vector.shape_cast %48 : vector<1xf32> to vector<1x1xf32>
      %c0_40 = arith.constant 0 : index
      %c0_41 = arith.constant 0 : index
      %50 = vector.load %arg9[%c0_40, %c0_41] : memref<1x128xf32, #tpu.memory_space<vmem>>, vector<1x128xf32>
      %cst_42 = arith.constant dense<0.000000e+00> : vector<1xf32>
      %51 = vector.multi_reduction <add>, %50, %cst_42 [1] : vector<1x128xf32> to vector<1xf32>
      %52 = vector.shape_cast %51 : vector<1xf32> to vector<1x1xf32>
      %cst_43 = arith.constant 2.000000e+00 : f32
      %53 = vector.broadcast %cst_43 : f32 to vector<1x1xf32>
      %54 = arith.mulf %53, %43 : vector<1x1xf32>
      %cst_44 = arith.constant 1.000000e+00 : f32
      %55 = vector.broadcast %cst_44 : f32 to vector<1x1xf32>
      %56 = arith.addf %54, %55 : vector<1x1xf32>
      %57 = arith.addf %46, %49 : vector<1x1xf32>
      %cst_45 = arith.constant 1.000000e+00 : f32
      %58 = vector.broadcast %cst_45 : f32 to vector<1x1xf32>
      %59 = arith.addf %57, %58 : vector<1x1xf32>
      %60 = arith.divf %56, %59 : vector<1x1xf32>
      %61 = arith.divf %52, %49 : vector<1x1xf32>
      %cst_46 = arith.constant 5.000000e-01 : f32
      %62 = vector.broadcast %cst_46 : f32 to vector<1x1xf32>
      %63 = arith.mulf %62, %61 : vector<1x1xf32>
      %64 = vector.shape_cast %60 : vector<1x1xf32> to vector<1x1x1xf32>
      %65 = vector.broadcast %64 : vector<1x1x1xf32> to vector<1x1x128xf32>
      %c0_47 = arith.constant 0 : index
      %c0_48 = arith.constant 0 : index
      %c0_49 = arith.constant 0 : index
      %66 = vector.load %arg4[%c0_47, %c0_48, %c0_49] : memref<1x1x128xf32, #tpu.memory_space<vmem>>, vector<1x1x128xf32>
      tpu.vector_store %arg4[%c0_47, %c0_48, %c0_49], %65 {strides = array<i32>} : memref<1x1x128xf32, #tpu.memory_space<vmem>>, vector<1x1x128xf32>,
      %67 = vector.shape_cast %63 : vector<1x1xf32> to vector<1x1x1xf32>
      %68 = vector.broadcast %67 : vector<1x1x1xf32> to vector<1x1x128xf32>
      %c0_50 = arith.constant 0 : index
      %c0_51 = arith.constant 0 : index
      %c0_52 = arith.constant 0 : index
      %69 = vector.load %arg5[%c0_50, %c0_51, %c0_52] : memref<1x1x128xf32, #tpu.memory_space<vmem>>, vector<1x1x128xf32>
      tpu.vector_store %arg5[%c0_50, %c0_51, %c0_52], %68 {strides = array<i32>} : memref<1x1x128xf32, #tpu.memory_space<vmem>>, vector<1x1x128xf32>,
    } else {
    }
    return
  }
  func.func @transform_0(%arg0: i32, %arg1: i32) -> (i32, i32, i32) {
    %c0_i32 = arith.constant 0 : i32
    %c0_i32_0 = arith.constant 0 : i32
    return %arg0, %arg1, %c0_i32 : i32, i32, i32
  }
  func.func @transform_1(%arg0: i32, %arg1: i32) -> (i32, i32, i32) {
    %c0_i32 = arith.constant 0 : i32
    %c0_i32_0 = arith.constant 0 : i32
    return %arg0, %arg1, %c0_i32 : i32, i32, i32
  }
  func.func @transform_2(%arg0: i32, %arg1: i32) -> (i32, i32, i32) {
    %c0_i32 = arith.constant 0 : i32
    %c0_i32_0 = arith.constant 0 : i32
    %c0_i32_1 = arith.constant 0 : i32
    return %arg0, %c0_i32, %c0_i32_0 : i32, i32, i32
  }
  func.func @transform_3(%arg0: i32, %arg1: i32) -> (i32, i32, i32) {
    %c0_i32 = arith.constant 0 : i32
    %c0_i32_0 = arith.constant 0 : i32
    %c0_i32_1 = arith.constant 0 : i32
    return %arg0, %c0_i32, %c0_i32_0 : i32, i32, i32
  }
}

</mosaic_0001>

<bundles_post_ra>
// kernel: dice_loss_with_empty_penalty.1
= control target key start
LH: loop header
LB: loop body
LE: loop exit
PB: predicated region body
PF: predicated region fallthrough
CT: control target
= control target key end

     0   :  { %s578_s12 = smov 0   ;;  %s580_s13 = smov 0   ;;  %s622_s0 = inlined_call_operand.vmem [shape: f32[4,32,128], index: 0, kind: input, shape index: {}]   ;;  %s623_s1 = inlined_call_operand.vmem [shape: f32[4,32,128], index: 1, kind: input, shape index: {}]   ;;  %s624_s2 = inlined_call_operand.vmem [shape: f32[4,1,128], index: 2, kind: output, shape index: {0}]   ;;  %s625_s3 = inlined_call_operand.vmem [shape: f32[4,1,128], index: 3, kind: output, shape index: {1}]  }
   0x1   :  { %s582_s14 = smov 0  }
   0x2 LB: > { %s26_s15 = sadd.s32 1, %s551_s13  ;;  %p479_p0 = scmp.ge.s32.totalorder %s555_s14, 1  ;;  %s555_s14 = sphi %s582_s14, %s14_s14   ;;  %s551_s13 = sphi %s580_s13, %s627_s13   ;;  %s547_s12 = sphi %s578_s12, %s626_s12  }
   0x3   : > { %p28_p1 = scmp.ge.s32.totalorder %s26_s15, 4  ;;  %p176_p2 = scmp.lt.s32.totalorder %s555_s14, 5 }
   0x5   : > { %s629_s15 = smov (%p28_p1, %s26_s15), 0  ;;  %p177_p3 = pnand %p479_p0, %p176_p2 }
   0x6   : > { %p215_p4 = scmp.lt.s32.totalorder (!%p177_p3), %s547_s12, 3 }
   0x7   : > { %180 = sbr.rel (%p177_p3) target bundleno = 243 (0xf3), region = 28 }
   0xc   : > { %v557_v0 = vmov 0.0   ;;  %s631_s12 = smov (!%p215_p4, %s547_s12), 3  ;;  %vm344_vm0 = vcmask 1040384  }
   0xd   : > { %245 = vst [vmem:[#allocation3] sm:$0x1] %v557_v0  ;;  %244 = vst [vmem:[#allocation2] sm:$0x1] %v557_v0  ;;  %s486_s16 = sshll.u32 %s631_s12, 5  ;;  %s239_s25 = scalar_lea.vmem %s625_s3, %s631_s12 }
   0xe   : > { %246 = vst [vmem:[#allocation4] sm:$0x1] %v557_v0  ;;  %247 = vst [vmem:[#allocation5] sm:$0x1] %v557_v0  ;;  %s222_s19 = scalar_lea.vmem %s622_s0, %s486_s16  ;;  %s232_s22 = scalar_lea.vmem %s623_s1, %s486_s16 }
   0xf   : > { %v248_v1 = vld [vmem:[%s222_s19] sm:$0xff]  ;;  %v249_v2 = vld [vmem:[%s222_s19 + $0x8] sm:$0xff]  ;;  %v250_v3 = vld [vmem:[%s222_s19 + $0x10] sm:$0xff]  ;;  %s236_s28 = scalar_lea.vmem %s624_s2, %s631_s12 }
  0x10   : > { %v251_v4 = vld [vmem:[%s222_s19 + $0x18] sm:$0xff]  ;;  %v256_v5 = vsub.f32 0.0, %v248_v1  ;;  %v257_v6 = vsub.f32 0.0, %v249_v2  ;;  %v258_v7 = vsub.f32 0.0, %v250_v3  ;;  %v252_v8 = vld [vmem:[%s232_s22] sm:$0xff]  ;;  %v253_v9 = vld [vmem:[%s232_s22 + $0x8] sm:$0xff] }
  0x11   : > { %v259_v10 = vsub.f32 0.0, %v251_v4  ;;  %v254_v11 = vld [vmem:[%s232_s22 + $0x10] sm:$0xff]  ;;  %v255_v12 = vld [vmem:[%s232_s22 + $0x18] sm:$0xff]  ;;  %v317_v13 = vadd.f32 %v253_v9, %v252_v8 }
  0x12   : > { %v260_v14 = vmul.f32 1.442695, %v256_v5  ;;  %v262_v15 = vmul.f32 1.442695, %v257_v6  ;;  %v264_v16 = vmul.f32 1.442695, %v258_v7 }
  0x13   : > { %v266_v17 = vmul.f32 1.442695, %v259_v10  ;;  %v318_v18 = vadd.f32 %v317_v13, %v254_v11 }
  0x14   : > { %513 = vpow2.f32 %v260_v14 }
  0x15   : > { %515 = vpow2.f32 %v262_v15  ;;  %v319_v19 = vadd.f32 %v318_v18, %v255_v12  ;;  %v316_v25 = vld [vmem:[#allocation4] sm:$0x1]  ;;  %v328_v18 = vld [vmem:[#allocation5] sm:$0x1] }
  0x16   : > { %517 = vpow2.f32 %v264_v16 }
  0x17   : > { %519 = vpow2.f32 %v266_v17  ;;  %v320_v20 = vrot.slane %v319_v19, 4 }
  0x19   : > { %v321_v21 = vadd.f32 %v320_v20, %v319_v19 }
  0x1b   : > { %v322_v22 = vrot.slane %v321_v21, 2 }
  0x1d   : > { %v323_v23 = vadd.f32 %v322_v22, %v321_v21 }
  0x1f   : > { %v324_v24 = vrot.slane %v323_v23, 1 }
  0x21   : > { %v514_v26 = vpop.eup %513  ;;  %v325_v27 = vadd.f32 %v324_v24, %v323_v23 }
  0x22   : > { %v516_v28 = vpop.eup %515  ;;  %v268_v29 = vadd.f32 1.0, %v514_v26 }
  0x23   : > { %v518_v30 = vpop.eup %517  ;;  %v269_v31 = vadd.f32 1.0, %v516_v28  ;;  %v326_v32 = vadd.f32 %v325_v27, %v316_v25 }
  0x24   : > { %v520_v33 = vpop.eup %519  ;;  %v270_v34 = vadd.f32 1.0, %v518_v30  ;;  %521 = vrcp.f32 %v268_v29 }
  0x25   : > { %v271_v35 = vadd.f32 1.0, %v520_v33  ;;  %523 = vrcp.f32 %v269_v31  ;;  %327 = vst [vmem:[#allocation4] sm:$0x1] %v326_v32 }
  0x26   : > { %525 = vrcp.f32 %v270_v34 }
  0x27   : > { %527 = vrcp.f32 %v271_v35 }
  0x2c   : > { %v352_v22 = vld [vmem:[#allocation4] sm:$0x1] }
  0x2d   : > { %v353_v25 = vsel %vm344_vm0, %v352_v22, 0.0 }
  0x31   : > { %v522_v36 = vpop.eup %521 }
  0x32   : > { %v524_v37 = vpop.eup %523  ;;  %v280_v38 = vmul.f32 %v522_v36, %v252_v8  ;;  %v284_v39 = vsub.f32 1.0, %v522_v36 }
  0x33   : > { %v526_v40 = vpop.eup %525  ;;  %v305_v41 = vadd.f32 %v524_v37, %v522_v36  ;;  %v281_v42 = vmul.f32 %v524_v37, %v253_v9  ;;  %v285_v43 = vsub.f32 1.0, %v524_v37 }
  0x34   : > { %v528_v44 = vpop.eup %527  ;;  %v282_v45 = vmul.f32 %v526_v40, %v254_v11  ;;  %v286_v46 = vsub.f32 1.0, %v526_v40  ;;  %v288_v47 = vmul.f32 %v284_v39, %v252_v8  ;;  %v304_v8 = vld [vmem:[#allocation3] sm:$0x1] }
  0x35   : > { %v306_v48 = vadd.f32 %v526_v40, %v305_v41  ;;  %v283_v49 = vmul.f32 %v528_v44, %v255_v12  ;;  %v293_v50 = vadd.f32 %v281_v42, %v280_v38  ;;  %v287_v51 = vsub.f32 1.0, %v528_v44 }
  0x36   : > { %v289_v52 = vmul.f32 %v285_v43, %v253_v9  ;;  %v290_v53 = vmul.f32 %v286_v46, %v254_v11 }
  0x37   : > { %v307_v54 = vadd.f32 %v528_v44, %v306_v48  ;;  %v294_v55 = vadd.f32 %v293_v50, %v282_v45  ;;  %v291_v56 = vmul.f32 %v287_v51, %v255_v12  ;;  %v292_v12 = vld [vmem:[#allocation2] sm:$0x1] }
  0x38   : > { %v329_v57 = vadd.f32 %v289_v52, %v288_v47 }
  0x39   : > { %v308_v58 = vrot.slane %v307_v54, 4  ;;  %v295_v59 = vadd.f32 %v294_v55, %v283_v49 }
  0x3a   : > { %v330_v60 = vadd.f32 %v329_v57, %v290_v53 }
  0x3b   : > { %v309_v61 = vadd.f32 %v308_v58, %v307_v54  ;;  %v296_v62 = vrot.slane %v295_v59, 4 }
  0x3c   : > { %v331_v63 = vadd.f32 %v330_v60, %v291_v56 }
  0x3d   : > { %v310_v0 = vrot.slane %v309_v61, 2  ;;  %v297_v1 = vadd.f32 %v296_v62, %v295_v59 }
  0x3e   : > { %v332_v2 = vrot.slane %v331_v63, 4 }
  0x3f   : > { %v311_v3 = vadd.f32 %v310_v0, %v309_v61  ;;  %v298_v4 = vrot.slane %v297_v1, 2 }
  0x40   : > { %v333_v5 = vadd.f32 %v332_v2, %v331_v63 }
  0x41   : > { %v312_v6 = vrot.slane %v311_v3, 1  ;;  %v299_v7 = vadd.f32 %v298_v4, %v297_v1 }
  0x42   : > { %v334_v9 = vrot.slane %v333_v5, 2 }
  0x43   : > { %v313_v10 = vadd.f32 %v312_v6, %v311_v3  ;;  %v300_v11 = vrot.slane %v299_v7, 1 }
  0x44   : > { %v335_v13 = vadd.f32 %v334_v9, %v333_v5 }
  0x45   : > { %v314_v14 = vadd.f32 %v313_v10, %v304_v8  ;;  %v301_v15 = vadd.f32 %v300_v11, %v299_v7 }
  0x46   : > { %v336_v16 = vrot.slane %v335_v13, 1 }
  0x47   : > { %315 = vst [vmem:[#allocation3] sm:$0x1] %v314_v14  ;;  %v302_v17 = vadd.f32 %v301_v15, %v292_v12 }
  0x48   : > { %v337_v19 = vadd.f32 %v336_v16, %v335_v13 }
  0x49   : > { %303 = vst [vmem:[#allocation2] sm:$0x1] %v302_v17 }
  0x4a   : > { %v338_v20 = vadd.f32 %v337_v19, %v328_v18 }
  0x4c   : > { %339 = vst [vmem:[#allocation5] sm:$0x1] %v338_v20 }
  0x4e   : > { %v348_v21 = vld [vmem:[#allocation3] sm:$0x1] }
  0x4f   : > { %v349_v23 = vsel %vm344_vm0, %v348_v21, 0.0 }
  0x50   : > { %350 = vadd.xlane.f32.xlu0 %v349_v23  ;;  %v343_v24 = vld [vmem:[#allocation2] sm:$0x1] }
  0x51   : > { %v345_v26 = vsel %vm344_vm0, %v343_v24, 0.0 }
  0x52   : > { %346 = vadd.xlane.f32.xlu1 %v345_v26 }
  0x53   : > { %v356_v27 = vld [vmem:[#allocation5] sm:$0x1] }
  0x54   : > { %354 = vadd.xlane.f32.xlu0 %v353_v25  ;;  %v357_v28 = vsel %vm344_vm0, %v356_v27, 0.0 }
  0x56   : > { %358 = vadd.xlane.f32.xlu1 %v357_v28 }
  0xd9   : > { %v351_v29 = vpop.xlane.xlu0 %350 }
  0xdb   : > { %v347_v33 = vpop.xlane.xlu1 %346 }
  0xdc   : > { %v360_v35 = vmul.f32 2.0, %v347_v33 }
  0xdd   : > { %v355_v30 = vpop.xlane.xlu0 %354 }
  0xde   : > { %v362_v31 = vadd.f32 %v355_v30, %v351_v29  ;;  %529 = vrcp.f32 %v355_v30  ;;  %v361_v38 = vadd.f32 1.0, %v360_v35 }
  0xdf   : > { %v359_v34 = vpop.xlane.xlu1 %358 }
  0xe0   : > { %v363_v32 = vadd.f32 1.0, %v362_v31 }
  0xe2   : > { %531 = vrcp.f32 %v363_v32 }
  0xeb   : > { %v530_v36 = vpop.eup %529 }
  0xec   : > { %v367_v37 = vmul.f32 %v530_v36, %v359_v34 }
  0xee   : > { %v368_v39 = vmul.f32 0.5, %v367_v37 }
  0xef   : > { %v532_v40 = vpop.eup %531 }
  0xf0   : > { %v365_v41 = vmul.f32 %v532_v40, %v361_v38  ;;  %370 = vst [vmem:[%s239_s25] sm:$0x1] %v368_v39 }
  0xf2   : > { %369 = vst [vmem:[%s236_s28] sm:$0x1] %v365_v41 }
  0xf3 PF: > { %s14_s14 = sadd.s32 1, %s555_s14   ;;  %s626_s12 = smov %s551_s13 }
  0xf4   : > { %p11_p5 = scmp.ge.s32.totalorder %s14_s14, 6   ;;  %s627_s13 = smov %s629_s15 }
  0xf6   :  { %13 = sbr.rel (!%p11_p5) target bundleno = 2 (0x2), region = 81 }

</bundles_post_ra>
